<compile_context>
chip_gen: v7x
topology: tpu7x:2x2x1
jax: 0.10.0
libtpu: 0.0.40
codegen_flags: <defaults>
</compile_context>

<pallas_src>
import jax
import jax.numpy as jnp
from jax import lax
from jax.experimental import pallas as pl
from jax.experimental.pallas import tpu as pltpu


def _round_up(x, m):
    return ((x + m - 1) // m) * m


def _cdiv(a, b):
    return -(-a // b)


def _choose_tile(batch, tile_b):
    """Per-grid-step batch tile (rows)."""
    if batch <= 128:
        return batch                                   # single full-extent block
    b128 = _round_up(batch, 128)
    if b128 <= tile_b:
        # Split into >= 2 tiles so both v7x TensorCores get work.
        return _round_up(_cdiv(b128, 2), 128)
    # Balance tiles instead of padding the batch up to a multiple of tile_b.
    ntiles = _cdiv(b128, tile_b)
    return _round_up(_cdiv(b128, ntiles), 128)


def _choose_chunk(tb):
    """In-block compute chunk width (columns of the feature-major activations)."""
    if tb <= 512:
        return tb
    for c in (512, 384, 256, 128):
        if tb % c == 0:
            return c
    return tb


def _make_actor_kernel(bias_segments, w4_rows, chunk, nchunks):
    (o1, n1), (o2, n2), (o3, n3) = bias_segments

    def _block(x, w1, w2, w3, w4t, b1, b2, b3, b4, scale, add):
        # x: (chunk, state_dim) batch-major block.
        # Layer 1: W1 @ x^T (contract state axis of both operands) -> (16, chunk)
        # feature-major; the (state_dim -> chunk) transpose happens on-chip.
        a = lax.dot_general(w1, x, (((1,), (1,)), ((), ())),
                            preferred_element_type=jnp.float32) + b1
        a = jnp.maximum(a, 0.0)
        a = jnp.dot(w2, a, preferred_element_type=jnp.float32) + b2
        a = jnp.maximum(a, 0.0)
        a = jnp.dot(w3, a, preferred_element_type=jnp.float32) + b3
        a = jnp.maximum(a, 0.0)
        # Layer 4 straight to batch-major: a^T @ W4^T -> (chunk, action_dim).
        a = lax.dot_general(a, w4t, (((0,), (0,)), ((), ())),
                            preferred_element_type=jnp.float32)
        # max_action is already folded into scale/add on the host.
        return scale * jnp.tanh(a + b4) + add

    def kernel(x_ref, w1_ref, w2_ref, w3_ref, l4_ref, cb_ref, out_ref):
        w1 = w1_ref[...]
        w2 = w2_ref[...]
        w3 = w3_ref[...]
        l4 = l4_ref[...]
        cb = cb_ref[...]
        b1 = cb[o1:o1 + n1]                       # (16, 1) column biases
        b2 = cb[o2:o2 + n2]                       # (32, 1)
        b3 = cb[o3:o3 + n3]                       # (16, 1)
        w4t = l4[:w4_rows, :]                     # (16, action_dim)
        b4 = l4[w4_rows:w4_rows + 1, :]           # (1, action_dim) row vectors
        scale = l4[w4_rows + 1:w4_rows + 2, :]
        add = l4[w4_rows + 2:w4_rows + 3, :]

        # Static chunk loop: chunk * nchunks == tb (block rows).
        for ci in range(nchunks):
            lo, hi = ci * chunk, (ci + 1) * chunk
            out_ref[lo:hi, :] = _block(x_ref[lo:hi, :], w1, w2, w3, w4t,
                                       b1, b2, b3, b4, scale, add)

    return kernel


class ActorPallas:
    """Pallas TPU port of the TD3 Actor forward pass."""

    def __init__(self, params, action_scale, action_add, max_action,
                 tile_b=2048):
        assert tile_b % 128 == 0, "tile_b must be a multiple of the 128-lane width"
        w1, b1, w2, b2, w3, b3, w4, b4 = [jnp.asarray(p, jnp.float32)
                                          for p in params]
        self.state_dim = int(w1.shape[1])
        self.action_dim = int(w4.shape[0])
        self.tile_b = int(tile_b)

        # Fold max_action: (scale*tanh + add)*max == (scale*max)*tanh + (add*max).
        scale = jnp.asarray(action_scale, jnp.float32).reshape(-1) * float(max_action)
        add = jnp.asarray(action_add, jnp.float32).reshape(-1) * float(max_action)

        # Column-bias slab for layers 1..3 (feature-major adds), 8-row aligned.
        segs, rows = [], 0
        for v in (b1, b2, b3):
            segs.append((rows, int(v.shape[0])))
            rows += _round_up(int(v.shape[0]), 8)
        cb = jnp.zeros((rows, 1), jnp.float32)
        for (off, n), v in zip(segs, (b1, b2, b3)):
            cb = cb.at[off:off + n, 0].set(v)
        self._bias_segments = tuple(segs)
        self._cb = cb

        # Layer-4 slab: rows [0, in4) = W4^T, then b4 / scale / add row vectors.
        in4 = int(w4.shape[1])
        l4 = jnp.zeros((_round_up(in4 + 3, 8), self.action_dim), jnp.float32)
        l4 = l4.at[:in4, :].set(w4.T)
        l4 = l4.at[in4, :].set(b4)
        l4 = l4.at[in4 + 1, :].set(scale)
        l4 = l4.at[in4 + 2, :].set(add)
        self._w4_rows = in4
        self._l4 = l4

        self._w1, self._w2, self._w3 = w1, w2, w3
        # Params are packed once here; the per-shape forward is jitted
        # (parameters become baked-in constants).
        self._fwd = jax.jit(self._forward)

    def _forward(self, state):
        batch = state.shape[0]
        tb = _choose_tile(batch, self.tile_b)
        chunk = _choose_chunk(tb)
        nchunks = tb // chunk
        ntiles = _cdiv(batch, tb)

        kernel = _make_actor_kernel(self._bias_segments, self._w4_rows,
                                    chunk, nchunks)

        def resident(shape):        # whole-array block, same block every step
            return pl.BlockSpec(shape, lambda i: (0, 0))

        return pl.pallas_call(
            kernel,
            out_shape=jax.ShapeDtypeStruct((batch, self.action_dim), jnp.float32),
            grid=(ntiles,),
            in_specs=[
                pl.BlockSpec((tb, self.state_dim), lambda i: (i, 0)),  # streamed
                resident(self._w1.shape),
                resident(self._w2.shape),
                resident(self._w3.shape),
                resident(self._l4.shape),
                resident(self._cb.shape),
            ],
            out_specs=pl.BlockSpec((tb, self.action_dim), lambda i: (i, 0)),
            compiler_params=pltpu.CompilerParams(
                dimension_semantics=("parallel",)),
        )(state.astype(jnp.float32), self._w1, self._w2, self._w3,
          self._l4, self._cb)

    def __call__(self, state):
        return self._fwd(state)


# ----------------------------- test scaffolding -----------------------------

def _snap_bf16(x):
    # Snap values onto the bf16 grid so that bf16-pass and full-f32 matmul
    # paths agree (bf16 x bf16 products are exact in f32); this keeps the
    # kernel-vs-reference comparison tight without depending on the backend's
    # default matmul precision.
    return jnp.asarray(x, jnp.float32).astype(jnp.bfloat16).astype(jnp.float32)


def init_params(key, state_dim, action_dim):
    """PyTorch-Linear-style uniform init, weights in (out, in) torch layout."""
    dims = [(state_dim, 16), (16, 32), (32, 16), (16, action_dim)]
    params = []
    for fan_in, fan_out in dims:
        key, kw, kb = jax.random.split(key, 3)
        bound = 1.0 / (fan_in ** 0.5)
        w = jax.random.uniform(kw, (fan_out, fan_in), jnp.float32, -bound, bound)
        b = jax.random.uniform(kb, (fan_out,), jnp.float32, -bound, bound)
        params += [_snap_bf16(w), _snap_bf16(b)]
    return params


def _reference(state, params, action_scale, action_add, max_action):
    w1, b1, w2, b2, w3, b3, w4, b4 = params
    a = jnp.maximum(state @ w1.T + b1, 0.0)
    a = jnp.maximum(a @ w2.T + b2, 0.0)
    a = jnp.maximum(a @ w3.T + b3, 0.0)
    a = a @ w4.T + b4
    return (action_scale * jnp.tanh(a) + action_add) * max_action


if __name__ == "__main__":
    key = jax.random.PRNGKey(0)

    batch = 2
    state_dim = 8
    action_dim = 4
    max_action = 2.0

    key, k_state, k_scale, k_add = jax.random.split(key, 4)
    state = _snap_bf16(jax.random.normal(k_state, (batch, state_dim), jnp.float32))
    action_scale = _snap_bf16(
        jax.random.uniform(k_scale, (action_dim,), jnp.float32, 0.5, 1.5))
    action_add = _snap_bf16(
        jax.random.uniform(k_add, (action_dim,), jnp.float32, -0.1, 0.1))

    params = init_params(key, state_dim, action_dim)
    actor = ActorPallas(params, action_scale, action_add, max_action)

    # Small batch: single full-extent block.
    out = jax.block_until_ready(actor(state))
    ref = _reference(state, params, action_scale, action_add, max_action)
    assert out.shape == (batch, action_dim)
    assert jnp.allclose(out, ref, atol=1e-3), "small-batch mismatch vs reference"

    # Larger, non-multiple-of-128 batch: multi-tile "parallel" grid with a
    # ragged last block (no host-side padding or transposes).
    key, k_big = jax.random.split(key)
    big_state = _snap_bf16(jax.random.normal(k_big, (300, state_dim), jnp.float32))
    out_big = jax.block_until_ready(actor(big_state))
    ref_big = _reference(big_state, params, action_scale, action_add, max_action)
    assert out_big.shape == (300, action_dim)
    assert jnp.allclose(out_big, ref_big, atol=1e-3), "big-batch mismatch vs reference"

    print("KERNEL_OK")
</pallas_src>

<mosaic_0001>
module attributes {stable_mosaic.version = 11 : i64} {
  func.func @kernel(%arg0: i32, %arg1: memref<2x8xf32, #tpu.memory_space<vmem>>, %arg2: memref<16x8xf32, #tpu.memory_space<vmem>>, %arg3: memref<32x16xf32, #tpu.memory_space<vmem>>, %arg4: memref<16x32xf32, #tpu.memory_space<vmem>>, %arg5: memref<24x4xf32, #tpu.memory_space<vmem>>, %arg6: memref<64x1xf32, #tpu.memory_space<vmem>>, %arg7: memref<2x4xf32, #tpu.memory_space<vmem>>) attributes {dimension_semantics = [#tpu.dimension_semantics<parallel>], iteration_bounds = array<i64: 1>, scalar_prefetch = 0 : i64, scratch_operands = 0 : i64, tpu.core_type = #tpu.core_type<tc>, window_params = [{transform_indices = @transform_0, window_bounds = array<i64: 2, 8>}, {pipeline_mode = #tpu.pipeline_mode<synchronous>, transform_indices = @transform_1, window_bounds = array<i64: 16, 8>}, {pipeline_mode = #tpu.pipeline_mode<synchronous>, transform_indices = @transform_2, window_bounds = array<i64: 32, 16>}, {pipeline_mode = #tpu.pipeline_mode<synchronous>, transform_indices = @transform_3, window_bounds = array<i64: 16, 32>}, {pipeline_mode = #tpu.pipeline_mode<synchronous>, transform_indices = @transform_4, window_bounds = array<i64: 24, 4>}, {pipeline_mode = #tpu.pipeline_mode<synchronous>, transform_indices = @transform_5, window_bounds = array<i64: 64, 1>}, {transform_indices = @transform_6, window_bounds = array<i64: 2, 4>}]} {
    %c0 = arith.constant 0 : index
    %c0_0 = arith.constant 0 : index
    %0 = vector.load %arg2[%c0, %c0_0] : memref<16x8xf32, #tpu.memory_space<vmem>>, vector<16x8xf32>
    %c0_1 = arith.constant 0 : index
    %c0_2 = arith.constant 0 : index
    %1 = vector.load %arg3[%c0_1, %c0_2] : memref<32x16xf32, #tpu.memory_space<vmem>>, vector<32x16xf32>
    %c0_3 = arith.constant 0 : index
    %c0_4 = arith.constant 0 : index
    %2 = vector.load %arg4[%c0_3, %c0_4] : memref<16x32xf32, #tpu.memory_space<vmem>>, vector<16x32xf32>
    %c0_5 = arith.constant 0 : index
    %c0_6 = arith.constant 0 : index
    %3 = vector.load %arg5[%c0_5, %c0_6] : memref<24x4xf32, #tpu.memory_space<vmem>>, vector<24x4xf32>
    %c0_7 = arith.constant 0 : index
    %c0_8 = arith.constant 0 : index
    %4 = vector.load %arg6[%c0_7, %c0_8] : memref<64x1xf32, #tpu.memory_space<vmem>>, vector<64x1xf32>
    %5 = vector.extract_strided_slice %4 {offsets = [0, 0], sizes = [16, 1], strides = [1, 1]} : vector<64x1xf32> to vector<16x1xf32>
    %6 = vector.extract_strided_slice %4 {offsets = [16, 0], sizes = [32, 1], strides = [1, 1]} : vector<64x1xf32> to vector<32x1xf32>
    %7 = vector.extract_strided_slice %4 {offsets = [48, 0], sizes = [16, 1], strides = [1, 1]} : vector<64x1xf32> to vector<16x1xf32>
    %8 = vector.extract_strided_slice %3 {offsets = [0, 0], sizes = [16, 4], strides = [1, 1]} : vector<24x4xf32> to vector<16x4xf32>
    %9 = vector.extract_strided_slice %3 {offsets = [16, 0], sizes = [1, 4], strides = [1, 1]} : vector<24x4xf32> to vector<1x4xf32>
    %10 = vector.extract_strided_slice %3 {offsets = [17, 0], sizes = [1, 4], strides = [1, 1]} : vector<24x4xf32> to vector<1x4xf32>
    %11 = vector.extract_strided_slice %3 {offsets = [18, 0], sizes = [1, 4], strides = [1, 1]} : vector<24x4xf32> to vector<1x4xf32>
    %c0_9 = arith.constant 0 : index
    %c0_10 = arith.constant 0 : index
    %12 = vector.load %arg1[%c0_9, %c0_10] : memref<2x8xf32, #tpu.memory_space<vmem>>, vector<2x8xf32>
    %cst = arith.constant dense<0.000000e+00> : vector<16x2xf32>
    %13 = tpu.matmul %0, %12, %cst {dimension_numbers = #tpu.dot_dimension_numbers<[1], [1], [0], [0], [0, 0, 1, 0], [], []>} : vector<16x8xf32>, vector<2x8xf32>, vector<16x2xf32> -> vector<16x2xf32>
    %14 = vector.broadcast %5 : vector<16x1xf32> to vector<16x2xf32>
    %15 = arith.addf %13, %14 : vector<16x2xf32>
    %cst_11 = arith.constant 0.000000e+00 : f32
    %16 = vector.broadcast %cst_11 : f32 to vector<16x2xf32>
    %17 = arith.maximumf %15, %16 : vector<16x2xf32>
    %cst_12 = arith.constant dense<0.000000e+00> : vector<32x2xf32>
    %18 = tpu.matmul %1, %17, %cst_12 {dimension_numbers = #tpu.dot_dimension_numbers<[1], [0], [0], [1], [0, 0, 1, 1], [], []>} : vector<32x16xf32>, vector<16x2xf32>, vector<32x2xf32> -> vector<32x2xf32>
    %19 = vector.broadcast %6 : vector<32x1xf32> to vector<32x2xf32>
    %20 = arith.addf %18, %19 : vector<32x2xf32>
    %cst_13 = arith.constant 0.000000e+00 : f32
    %21 = vector.broadcast %cst_13 : f32 to vector<32x2xf32>
    %22 = arith.maximumf %20, %21 : vector<32x2xf32>
    %cst_14 = arith.constant dense<0.000000e+00> : vector<16x2xf32>
    %23 = tpu.matmul %2, %22, %cst_14 {dimension_numbers = #tpu.dot_dimension_numbers<[1], [0], [0], [1], [0, 0, 1, 1], [], []>} : vector<16x32xf32>, vector<32x2xf32>, vector<16x2xf32> -> vector<16x2xf32>
    %24 = vector.broadcast %7 : vector<16x1xf32> to vector<16x2xf32>
    %25 = arith.addf %23, %24 : vector<16x2xf32>
    %cst_15 = arith.constant 0.000000e+00 : f32
    %26 = vector.broadcast %cst_15 : f32 to vector<16x2xf32>
    %27 = arith.maximumf %25, %26 : vector<16x2xf32>
    %cst_16 = arith.constant dense<0.000000e+00> : vector<2x4xf32>
    %28 = tpu.matmul %27, %8, %cst_16 {dimension_numbers = #tpu.dot_dimension_numbers<[0], [0], [1], [1], [0, 1, 1, 1], [], []>} : vector<16x2xf32>, vector<16x4xf32>, vector<2x4xf32> -> vector<2x4xf32>
    %29 = vector.broadcast %9 : vector<1x4xf32> to vector<2x4xf32>
    %30 = arith.addf %28, %29 : vector<2x4xf32>
    %31 = math.tanh %30 : vector<2x4xf32>
    %32 = vector.broadcast %10 : vector<1x4xf32> to vector<2x4xf32>
    %33 = arith.mulf %32, %31 : vector<2x4xf32>
    %34 = vector.broadcast %11 : vector<1x4xf32> to vector<2x4xf32>
    %35 = arith.addf %33, %34 : vector<2x4xf32>
    %c0_17 = arith.constant 0 : index
    %c0_18 = arith.constant 0 : index
    %36 = vector.load %arg7[%c0_17, %c0_18] : memref<2x4xf32, #tpu.memory_space<vmem>>, vector<2x4xf32>
    tpu.vector_store %arg7[%c0_17, %c0_18], %35 {strides = array<i32>} : memref<2x4xf32, #tpu.memory_space<vmem>>, vector<2x4xf32>,
    return
  }
  func.func @transform_0(%arg0: i32) -> (i32, i32) {
    %c0_i32 = arith.constant 0 : i32
    %c0_i32_0 = arith.constant 0 : i32
    return %arg0, %c0_i32 : i32, i32
  }
  func.func @transform_1(%arg0: i32) -> (i32, i32) {
    %c0_i32 = arith.constant 0 : i32
    %c0_i32_0 = arith.constant 0 : i32
    %c0_i32_1 = arith.constant 0 : i32
    return %c0_i32, %c0_i32_0 : i32, i32
  }
  func.func @transform_2(%arg0: i32) -> (i32, i32) {
    %c0_i32 = arith.constant 0 : i32
    %c0_i32_0 = arith.constant 0 : i32
    %c0_i32_1 = arith.constant 0 : i32
    return %c0_i32, %c0_i32_0 : i32, i32
  }
  func.func @transform_3(%arg0: i32) -> (i32, i32) {
    %c0_i32 = arith.constant 0 : i32
    %c0_i32_0 = arith.constant 0 : i32
    %c0_i32_1 = arith.constant 0 : i32
    return %c0_i32, %c0_i32_0 : i32, i32
  }
  func.func @transform_4(%arg0: i32) -> (i32, i32) {
    %c0_i32 = arith.constant 0 : i32
    %c0_i32_0 = arith.constant 0 : i32
    %c0_i32_1 = arith.constant 0 : i32
    return %c0_i32, %c0_i32_0 : i32, i32
  }
  func.func @transform_5(%arg0: i32) -> (i32, i32) {
    %c0_i32 = arith.constant 0 : i32
    %c0_i32_0 = arith.constant 0 : i32
    %c0_i32_1 = arith.constant 0 : i32
    return %c0_i32, %c0_i32_0 : i32, i32
  }
  func.func @transform_6(%arg0: i32) -> (i32, i32) {
    %c0_i32 = arith.constant 0 : i32
    %c0_i32_0 = arith.constant 0 : i32
    return %arg0, %c0_i32 : i32, i32
  }
}

</mosaic_0001>

<bundles_post_ra>
// kernel: _forward.1
= control target key start
LH: loop header
LB: loop body
LE: loop exit
PB: predicated region body
PF: predicated region fallthrough
CT: control target
= control target key end

     0   :  { %11 = vsyncpa [#allocation3], 0  ;;  %s988_s0 = inlined_call_operand.hbm [shape: f32[2,8], index: 0, kind: input, shape index: {}]   ;;  %s989_s1 = inlined_call_operand.hbm [shape: f32[16,8], index: 1, kind: input, shape index: {}]   ;;  %s990_s2 = inlined_call_operand.hbm [shape: f32[32,16], index: 2, kind: input, shape index: {}]   ;;  %s991_s3 = inlined_call_operand.hbm [shape: f32[16,32], index: 3, kind: input, shape index: {}]   ;;  %s992_s4 = inlined_call_operand.hbm [shape: f32[24,4], index: 4, kind: input, shape index: {}]   ;;  %s993_s5 = inlined_call_operand.hbm [shape: f32[64,1], index: 5, kind: input, shape index: {}]   ;;  %s994_s6 = inlined_call_operand.hbm [shape: f32[2,4], index: 6, kind: output, shape index: {}]  }
   0x1   :  { %12 = vsyncpa [#allocation6], 0 }
   0x2   :  { %13 = vsyncpa [#allocation9], 0 }
   0x3   :  { %14 = vsyncpa [#allocation12], 0 }
   0x4   :  { %15 = vsyncpa [#allocation4], 0  ;;  %s834_s21 = smov [#allocation5]   ;;  %s670_s25 = scalar_lea.hbm %s989_s1, 256 }
   0x5   :  { %s31_s22 = sshll.u32 %s834_s21, 4  ;;  %p671_p0 = scmp.ne.s32.totalorder %s989_s1, %s670_s25  ;;  %s32_s22 = int_to_ptr.vmem [resolvable:$true] %s31_s22 }
   0x6   :  { %p674_p1 = scmp.lt.u32.totalorder %s670_s25, %s989_s1 }
   0x8   :  { %p676_p2 = pnand %p674_p1, %p671_p0 }
   0xa   :  { %679 = shalt.err (!%p676_p2)
}
   0xb   :  { %s680_s30 = scalar_lea.vmem %s32_s22, 256  ;;  %p685_p4 = scmp.lt.s32.totalorder %s32_s22, %s32_s22 }
   0xc   :  { %p681_p3 = scmp.ne.s32.totalorder %s32_s22, %s680_s30  ;;  %p686_p5 = scmp.lt.s32.totalorder %s680_s30, %s680_s30 }
   0xe   :  { %p687_p6 = por %p686_p5, %p685_p4 }
  0x10   :  { %p688_p7 = pnand %p687_p6, %p681_p3 }
  0x12   :  { %691 = shalt.err (!%p688_p7)
}
  0x13   :  { %s835_s7 = smov 128   ;;  %s836_s8 = smov 8  }
  0x14   :  { %37 = dma.hbm_to_vmem [thread:$0]  %s989_s1, 256, %s32_s22, [#allocation6], %s835_s7, %s835_s7, %s836_s8  }
  0x15   :  { %s837_s11 = smov [#allocation8]   ;;  %s838_s13 = smov [#allocation2]  }
  0x16   :  { %s55_s12 = sshll.u32 %s837_s11, 4  ;;  %s22_s14 = sshll.u32 %s838_s13, 4  ;;  %s56_s12 = int_to_ptr.vmem [resolvable:$true] %s55_s12  ;;  %s23_s14 = int_to_ptr.vmem [resolvable:$true] %s22_s14 }
  0x17   :  { %s692_s17 = scalar_lea.hbm %s991_s3, 256 }
  0x18   :  { %p693_p8 = scmp.ne.s32.totalorder %s991_s3, %s692_s17  ;;  %p696_p9 = scmp.lt.u32.totalorder %s692_s17, %s991_s3 }
  0x1a   :  { %p698_p10 = pnand %p696_p9, %p693_p8 }
  0x1c   :  { %701 = shalt.err (!%p698_p10)
}
  0x1d   :  { %s702_s1 = scalar_lea.vmem %s56_s12, 256  ;;  %p707_p12 = scmp.lt.s32.totalorder %s56_s12, %s56_s12 }
  0x1e   :  { %p703_p11 = scmp.ne.s32.totalorder %s56_s12, %s702_s1  ;;  %p708_p13 = scmp.lt.s32.totalorder %s702_s1, %s702_s1 }
  0x20   :  { %p709_p0 = por %p708_p13, %p707_p12 }
  0x22   :  { %p710_p1 = pnand %p709_p0, %p703_p11 }
  0x24   :  { %713 = shalt.err (!%p710_p1)
}
  0x25   :  { %61 = dma.hbm_to_vmem [thread:$0]  %s991_s3, 256, %s56_s12, [#allocation9], %s835_s7, %s835_s7, %s836_s8  }
  0x26   :  { %s714_s26 = scalar_lea.hbm %s988_s0, 32 }
  0x27   :  { %p715_p2 = scmp.ne.s32.totalorder %s988_s0, %s714_s26  ;;  %p718_p3 = scmp.lt.u32.totalorder %s714_s26, %s988_s0 }
  0x29   :  { %p720_p4 = pnand %p718_p3, %p715_p2 }
  0x2b   :  { %723 = shalt.err (!%p720_p4)
}
  0x2c   :  { %s724_s9 = scalar_lea.vmem %s23_s14, 32  ;;  %p729_p6 = scmp.lt.s32.totalorder %s23_s14, %s23_s14 }
  0x2d   :  { %p725_p5 = scmp.ne.s32.totalorder %s23_s14, %s724_s9  ;;  %p730_p7 = scmp.lt.s32.totalorder %s724_s9, %s724_s9 }
  0x2f   :  { %p731_p8 = por %p730_p7, %p729_p6 }
  0x31   :  { %p732_p9 = pnand %p731_p8, %p725_p5 }
  0x33   :  { %735 = shalt.err (!%p732_p9)
}
  0x34   :  { %25 = dma.hbm_to_vmem [thread:$0]  %s988_s0, 32, %s23_s14, [#allocation3]  }
  0x35   :  { %s839_s11 = smov [#allocation7]   ;;  %s840_s13 = smov [#allocation10]  }
  0x36   :  { %s43_s12 = sshll.u32 %s839_s11, 4  ;;  %s67_s15 = sshll.u32 %s840_s13, 4  ;;  %s44_s12 = int_to_ptr.vmem [resolvable:$true] %s43_s12  ;;  %s68_s15 = int_to_ptr.vmem [resolvable:$true] %s67_s15 }
  0x37   :  { %s736_s18 = scalar_lea.hbm %s990_s2, 512 }
  0x38   :  { %p737_p10 = scmp.ne.s32.totalorder %s990_s2, %s736_s18  ;;  %p740_p11 = scmp.lt.u32.totalorder %s736_s18, %s990_s2 }
  0x3a   :  { %p742_p12 = pnand %p740_p11, %p737_p10 }
  0x3c   :  { %745 = shalt.err (!%p742_p12)
}
  0x3d   :  { %s746_s0 = scalar_lea.vmem %s44_s12, 512  ;;  %p751_p0 = scmp.lt.s32.totalorder %s44_s12, %s44_s12 }
  0x3e   :  { %p747_p13 = scmp.ne.s32.totalorder %s44_s12, %s746_s0  ;;  %p752_p1 = scmp.lt.s32.totalorder %s746_s0, %s746_s0 }
  0x40   :  { %p753_p2 = por %p752_p1, %p751_p0 }
  0x42   :  { %p754_p3 = pnand %p753_p2, %p747_p13 }
  0x44   :  { %757 = shalt.err (!%p754_p3)
}
  0x45   :  { %49 = dma.hbm_to_vmem [thread:$0]  %s990_s2, 512, %s44_s12, [#allocation6], %s835_s7, %s835_s7, %s836_s8  }
  0x46   :  { %s758_s25 = scalar_lea.hbm %s992_s4, 384 }
  0x47   :  { %p759_p4 = scmp.ne.s32.totalorder %s992_s4, %s758_s25  ;;  %p762_p5 = scmp.lt.u32.totalorder %s758_s25, %s992_s4 }
  0x49   :  { %p764_p6 = pnand %p762_p5, %p759_p4 }
  0x4b   :  { %767 = shalt.err (!%p764_p6)
}
  0x4c   :  { %s768_s30 = scalar_lea.vmem %s68_s15, 384  ;;  %p773_p8 = scmp.lt.s32.totalorder %s68_s15, %s68_s15 }
  0x4d   :  { %p769_p7 = scmp.ne.s32.totalorder %s68_s15, %s768_s30  ;;  %p774_p9 = scmp.lt.s32.totalorder %s768_s30, %s768_s30 }
  0x4f   :  { %p775_p10 = por %p774_p9, %p773_p8 }
  0x51   :  { %p776_p11 = pnand %p775_p10, %p769_p7 }
  0x53   :  { %779 = shalt.err (!%p776_p11)
}
  0x54   :  { %73 = dma.hbm_to_vmem [thread:$0]  %s992_s4, 384, %s68_s15, [#allocation9], %s835_s7, %s835_s7, %s836_s8  }
  0x55   :  { %s841_s3 = smov [#allocation11]   ;;  %s780_s13 = scalar_lea.hbm %s993_s5, 1024 }
  0x56   :  { %s79_s10 = sshll.u32 %s841_s3, 4  ;;  %p781_p12 = scmp.ne.s32.totalorder %s993_s5, %s780_s13  ;;  %s80_s10 = int_to_ptr.vmem [resolvable:$true] %s79_s10 }
  0x57   :  { %p784_p13 = scmp.lt.u32.totalorder %s780_s13, %s993_s5 }
  0x59   :  { %p786_p0 = pnand %p784_p13, %p781_p12 }
  0x5b   :  { %789 = shalt.err (!%p786_p0)
}
  0x5c   :  { %s790_s20 = scalar_lea.vmem %s80_s10, 1024  ;;  %p795_p2 = scmp.lt.s32.totalorder %s80_s10, %s80_s10 }
  0x5d   :  { %p791_p1 = scmp.ne.s32.totalorder %s80_s10, %s790_s20  ;;  %p796_p3 = scmp.lt.s32.totalorder %s790_s20, %s790_s20 }
  0x5f   :  { %p797_p4 = por %p796_p3, %p795_p2 }
  0x61   :  { %p798_p5 = pnand %p797_p4, %p791_p1 }
  0x63   :  { %801 = shalt.err (!%p798_p5)
}
  0x64   :  { %85 = dma.hbm_to_vmem [thread:$0]  %s993_s5, 1024, %s80_s10, [#allocation12], %s835_s7, %s835_s7, %s836_s8  }
  0x65   :  { %824 = dma.done.wait [#allocation3], 32  }
  0x66   :  { %825 = vsyncadd [#allocation3], 4294967264 }
  0x67   :  { %826 = dma.done.wait [#allocation6], 768  }
  0x68   :  { %827 = vsyncadd [#allocation6], 4294966528 }
  0x69   :  { %828 = dma.done.wait [#allocation9], 640  }
  0x6a   :  { %829 = vsyncadd [#allocation9], 4294966656 }
  0x6b   :  { %830 = dma.done.wait [#allocation12], 1024  }
  0x6c   :  { %831 = vsyncadd [#allocation12], 4294966272  ;;  %v842_v0 = vmov 0   ;;  %vm134_vm0 = vcmask 64512   ;;  %v123_v1 = vld [vmem:[#allocation2] sm:$0x3]  ;;  %v437_v59 = vlaneseq }
  0x6d   :  { %666 = vset.pattern.permute.xlu0 %v842_v0  ;;  %667 = vset.pattern.permute.xlu1 %v842_v0  ;;  %v104_v2 = vld [vmem:[#allocation5] sm:$0xff]  ;;  %v115_v3 = vld [vmem:[#allocation11] sm:$0xff]  ;;  %v105_v4 = vld [vmem:[#allocation5 + $0x8] sm:$0xff]  ;;  %vm241_vm1 = vcmask 130048   ;;  %vm353_vm2 = vcmask 261120   ;;  %v843_v47 = vmov 0.0|0.0  }
  0x6e   :  { %605 = vmatprep.subr.msk.mxu0 %vm134_vm0, %v123_v1  ;;  %607 = vmatprep.mubr.msk.f32.mxu0 %vm134_vm0, %v104_v2  ;;  %v116_v5 = vld [vmem:[#allocation11 + $0x8] sm:$0xff]  ;;  %v119_v6 = vld [vmem:[#allocation11 + $0x20] sm:$0xff]  ;;  %v121_v7 = vld [vmem:[#allocation11 + $0x30] sm:$0xff]  ;;  %vm844_vm3 = vmmov 0   ;;  %v845_v49 = vmov 0.0   ;;  %v438_v60 = vshrl.u32 %v437_v59, 7 }
  0x6f   :  { %606 = vmatpush3.xpose.msk.msra.mxu0 %vm134_vm0, %v123_v1  ;;  %126 = vperm.xlu0 %666, %v115_v3   ;;  %v106_v8 = vld [vmem:[#allocation7] sm:$0xff]  ;;  %v117_v9 = vld [vmem:[#allocation11 + $0x10] sm:$0xff]  ;;  %v120_v11 = vld [vmem:[#allocation11 + $0x28] sm:$0xff]  ;;  %s846_s5 = smov [#allocation13]   ;;  %vm557_vm4 = vcmask 25600  }
  0x70   :  { %614 = vmatprep.mubr.msk.f32.mxu1 %vm241_vm1, %v106_v8  ;;  %223 = vperm.xlu1 %667, %v117_v9   ;;  %v118_v10 = vld [vmem:[#allocation11 + $0x18] sm:$0xff]  ;;  %v107_v22 = vld [vmem:[#allocation7 + $0x8] sm:$0xff]  ;;  %v108_v23 = vld [vmem:[#allocation7 + $0x10] sm:$0xff]  ;;  %v439_v61 = vsub.s32 0, %v438_v60  ;;  %v549_v3 = vsub.s32 1, %v438_v60  ;;  %s565_s7 = sshll.u32 %s846_s5, 4  ;;  %s566_s7 = int_to_ptr.vmem [resolvable:$true] %s565_s7 }
  0x71   :  { %v122_v12 = vld [vmem:[#allocation11 + $0x38] sm:$0xff]  ;;  %v109_v24 = vld [vmem:[#allocation7 + $0x18] sm:$0xff]  ;;  %v111_v44 = vld [vmem:[#allocation8 + $0x8] sm:$0xff]  ;;  %s802_s8 = scalar_lea.vmem %s566_s7, 32  ;;  %p807_p7 = scmp.lt.s32.totalorder %s566_s7, %s566_s7 }
  0x72   :  { %608 = vmatmul.mubr.msk.f32.vlgmr.msra.gmra.mrb[0].mxu0 %vm134_vm0, %v105_v4  ;;  %v110_v25 = vld [vmem:[#allocation8] sm:$0xff]  ;;  %v112_v45 = vld [vmem:[#allocation10] sm:$0xff]  ;;  %v113_v46 = vld [vmem:[#allocation10 + $0x8] sm:$0xff]  ;;  %v554_v4 = vsub.s32 2, %v438_v60  ;;  %p803_p6 = scmp.ne.s32.totalorder %s566_s7, %s802_s8  ;;  %p808_p8 = scmp.lt.s32.totalorder %s802_s8, %s802_s8 }
  0x73   :  { %131 = vperm.xlu0 %666, %v116_v5   ;;  %628 = vmatprep.mubr.msk.f32.mxu0 %vm353_vm2, %v110_v25  ;;  %v651_v48 = vpack.c.bf16 %v113_v46, %v112_v45  ;;  %v114_v62 = vld [vmem:[#allocation10 + $0x10] sm:$0xff] }
  0x74   :  { %228 = vperm.xlu1 %667, %v118_v10   ;;  %v440_v63 = vrot.slane %v114_v62, %v439_v61  ;;  %v550_v5 = vrot.slane %v114_v62, %v549_v3  ;;  %p809_p9 = por %p808_p8, %p807_p7 }
  0x76   :  { %p810_p10 = pnand %p809_p9, %p803_p6 }
  0x77   :  { %233 = vperm.xlu0 %666, %v119_v6   ;;  %v555_v6 = vrot.slane %v114_v62, %v554_v4 }
  0x78   :  { %238 = vperm.xlu1 %667, %v120_v11  }
  0x7b   :  { %345 = vperm.xlu0 %666, %v121_v7  }
  0x7c   :  { %350 = vperm.xlu1 %667, %v122_v12  }
  0xee   :  { %v127_v13 = vpop.permute.xlu0 %126 }
  0xef   :  { %v224_v26 = vpop.permute.xlu1 %223 }
  0xf2   :  { %v132_v14 = vpop.permute.xlu0 %131 }
  0xf3   :  { %v229_v27 = vpop.permute.xlu1 %228 }
  0xf6   :  { %v234_v36 = vpop.permute.xlu0 %233 }
  0xf7   :  { %v239_v33 = vpop.permute.xlu1 %238 }
  0xfa   :  { %v346_v51 = vpop.permute.xlu0 %345 }
  0xfb   :  { %v351_v54 = vpop.permute.xlu1 %350 }
 0x145   :  { %v609_v15 = vpop.f32.mrb[0].mxu0 }
 0x146   :  { %v216_v16 = vadd.f32 %v609_v15, %v132_v14  ;;  %v210_v17 = vpop.f32.mrb[1].mxu0 }
 0x147   :  { %v211_v18 = vadd.f32 %v210_v17, %v127_v13 }
 0x148   :  { %v220_v19 = vmax.f32 %v216_v16, 0.0 }
 0x149   :  { %v219_v20 = vmax.f32 %v211_v18, 0.0 }
 0x14b   :  { %v638_v21 = vpack.c.bf16 %v220_v19, %v219_v20 }
 0x14d   :  { %639 = vmatprep.subr.bf16.mxu1 %v638_v21 }
 0x14e   :  { %641 = vmatpush3.bf16.msra.mxu1 %v638_v21 }
 0x14f   :  { %650 = vmatprep.subr.bf16.mxu1 %v843_v47 }
 0x151   :  { %615 = vmatmul.mubr.msk.f32.vlgmr.msra.gmra.mrb[0].mxu1 %vm241_vm1, %v107_v22 }
 0x152   :  { %617 = vmatprep.mubr.msk.f32.mxu1 %vm241_vm1, %v108_v23  ;;  %652 = vmatpush3.bf16.msra.mxu1 %v651_v48 }
 0x155   :  { %618 = vmatmul.mubr.msk.f32.gmra.mrb[2].mxu1 %vm241_vm1, %v109_v24 }
 0x156   :  { %635 = vmatprep.mubr.msk.f32.mxu1 %vm844_vm3, %v845_v49 }
 0x224   :  { %v616_v28 = vpop.f32.mrb[0].mxu1 }
 0x225   :  { %v326_v29 = vadd.f32 %v616_v28, %v229_v27  ;;  %v320_v30 = vpop.f32.mrb[1].mxu1 }
 0x226   :  { %v321_v31 = vadd.f32 %v320_v30, %v224_v26 }
 0x227   :  { %v340_v32 = vmax.f32 %v326_v29, 0.0 }
 0x228   :  { %v339_v34 = vmax.f32 %v321_v31, 0.0  ;;  %v619_v35 = vpop.f32.mrb[2].mxu1 }
 0x229   :  { %v336_v37 = vadd.f32 %v619_v35, %v239_v33  ;;  %v330_v38 = vpop.f32.mrb[3].mxu1 }
 0x22a   :  { %v642_v39 = vpack.c.bf16 %v340_v32, %v339_v34  ;;  %v331_v40 = vadd.f32 %v330_v38, %v234_v36 }
 0x22b   :  { %v342_v41 = vmax.f32 %v336_v37, 0.0 }
 0x22c   :  { %v341_v42 = vmax.f32 %v331_v40, 0.0  ;;  %643 = vmatprep.subr.bf16.mxu0 %v642_v39 }
 0x22d   :  { %645 = vmatpush3.bf16.msra.mxu0 %v642_v39 }
 0x22e   :  { %v646_v43 = vpack.c.bf16 %v342_v41, %v341_v42 }
 0x230   :  { %647 = vmatprep.subr.bf16.mxu0 %v646_v43 }
 0x231   :  { %649 = vmatpush3.bf16.msra.mxu0 %v646_v43 }
 0x234   :  { %629 = vmatmul.mubr.msk.f32.vlgmr.msra.gmra.mrb[2].mxu0 %vm353_vm2, %v111_v44 }
 0x307   :  { %v630_v50 = vpop.f32.mrb[2].mxu0 }
 0x308   :  { %v426_v52 = vpop.f32.mrb[3].mxu0  ;;  %v432_v55 = vadd.f32 %v630_v50, %v351_v54 }
 0x309   :  { %v427_v53 = vadd.f32 %v426_v52, %v346_v51 }
 0x30a   :  { %v436_v57 = vmax.f32 %v432_v55, 0.0 }
 0x30b   :  { %v435_v56 = vmax.f32 %v427_v53, 0.0 }
 0x30d   :  { %441 = vxpose.xlu0.b32.start [1/2] (short) (narrow) %v435_v56, 8 }
 0x311   :  { %442 = vxpose.xlu0.b32.end [2/2] (short) (narrow) %v436_v57, 8 }
 0x38d   :  { %v457_v58 = vpop.trf.xlu0 }
 0x38e   :  { %636 = vmatmul.mubr.msk.f32.vlgmr.msra.gmra.mrb[4].mxu1 %vm241_vm1, %v457_v58 }
 0x461   :  { %v542_v0 = vpop.f32.mrb[4].mxu1 }
 0x462   :  { %v543_v1 = vadd.f32 %v542_v0, %v440_v63  ;;  %v637_v2 = vpop.f32.mrb[5].mxu1 }
 0x464   :  { %668 = vtanh.f32 %v543_v1 }
 0x46e   :  { %v669_v7 = vpop.eup %668 }
 0x46f   :  { %v551_v8 = vmul.f32 %v669_v7, %v550_v5 }
 0x471   :  { %v556_v9 = vadd.f32 %v555_v6, %v551_v8 }
 0x473   :  { %558 = vst.msk [vmem:[#allocation13] sm:$0x3] %vm557_vm4, %v556_v9 }
 0x474   :  { %813 = shalt.err (!%p810_p10)
}
 0x475   :  { %s814_s0 = scalar_lea.hbm %s994_s6, 32 }
 0x476   :  { %p815_p11 = scmp.ne.s32.totalorder %s994_s6, %s814_s0  ;;  %p818_p12 = scmp.lt.u32.totalorder %s814_s0, %s994_s6 }
 0x478   :  { %p820_p13 = pnand %p818_p12, %p815_p11 }
 0x47a   :  { %823 = shalt.err (!%p820_p13)
}
 0x47b   :  { %568 = dma.vmem_to_hbm [thread:$0]  %s566_s7, 32, %s994_s6, [#allocation4]  }
 0x47c   :  { %832 = dma.done.wait [#allocation4], 32  }
 0x47d   :  { %833 = vsyncadd [#allocation4], 4294967264 }
 0x47e   :  { %572 = vsyncpa [#allocation3], 1 }
 0x47f   :  { %573 = vsyncpa [#allocation6], 1 }
 0x480   :  { %574 = vsyncpa [#allocation9], 1 }
 0x481   :  { %575 = vsyncpa [#allocation12], 1 }
 0x482   :  { %576 = vsyncpa [#allocation4], 1 }

</bundles_post_ra>
